<compile_context>
chip_gen: v7x
topology: tpu7x:2x2x1
jax: 0.10.0
libtpu: 0.0.40
codegen_flags: <defaults>
</compile_context>

<pallas_src>
import jax
import jax.numpy as jnp
from jax.experimental import pallas as pl
from jax.experimental.pallas import tpu as pltpu

_MIB = 1024 * 1024


def _make_concat_kernel(last_n, H):
    """refs[0..last_n-1]: (TS, H) layer tiles (layer -(i+1) at position i),
    refs[last_n]: (TS, last_n*H) output tile."""

    def kernel(*refs):
        o_ref = refs[last_n]
        for i in range(last_n):                      # static unroll
            o_ref[:, i * H:(i + 1) * H] = refs[i][...]

    return kernel


def _vmem_budgets():
    """Generation-aware (vmem_limit_bytes, tile_budget_bytes)."""
    try:
        cap = pltpu.get_tpu_info().vmem_capacity_bytes
    except Exception:
        cap = 64 * _MIB                              # v7x-sized conservative fallback
    # Compiler limit well under physical capacity:
    #   128 MiB parts (v5e/v6e) -> 96 MiB limit;  64 MiB parts (v7x) -> 48 MiB.
    vmem_limit = min(96 * _MIB, (3 * cap) // 4)
    # Double-buffered in+out footprint targets ~0.75 of the limit.
    tile_budget = (3 * vmem_limit) // 4
    return vmem_limit, tile_budget


def _pick_row_tile(rows, last_n, H, itemsize, tile_budget_bytes):
    """Largest row tile TS that respects sublane packing and keeps the
    double-buffered in+out footprint (4*last_n*TS*H*itemsize) in budget."""
    sub_mult = {4: 8, 2: 16, 1: 32}.get(itemsize, 8)
    bytes_per_row = 4 * last_n * H * itemsize        # 2x in + 2x out buffers
    max_ts = max(sub_mult, tile_budget_bytes // bytes_per_row)
    rows_ceil = -(-rows // sub_mult) * sub_mult      # no point exceeding rows
    max_ts = min(max_ts, max(sub_mult, rows_ceil))
    for cand in (8192, 4096, 2048, 1024, 512, 256, 128, 64, 32, 16, 8):
        if cand % sub_mult == 0 and cand <= max_ts:
            return cand
    return sub_mult


def concatenate_pooling(all_hidden_states, last_n):
    """all_hidden_states: sequence of (B, S, H) arrays, or a stacked
    (L, B, S, H) array. Returns (B, S, H * last_n)."""
    if isinstance(all_hidden_states, (list, tuple)):
        stacked = None
        layers = [all_hidden_states[-(i + 1)] for i in range(last_n)]
        B, S, H = layers[0].shape
        dtype = layers[0].dtype
    else:
        stacked = all_hidden_states                  # (L, B, S, H)
        L, B, S, H = stacked.shape
        dtype = stacked.dtype

    itemsize = jnp.dtype(dtype).itemsize
    rows = B * S

    vmem_limit, tile_budget = _vmem_budgets()
    TS = _pick_row_tile(rows, last_n, H, itemsize, tile_budget)
    n_r = pl.cdiv(rows, TS)        # ragged last block is padded/clipped by Pallas

    kernel = _make_concat_kernel(last_n, H)

    if stacked is None:
        # Flatten (B, S) -> rows; contiguous leading-dim reshape is metadata-only.
        inputs = [layer.reshape(rows, H) for layer in layers]
        in_specs = [
            pl.BlockSpec((TS, H), lambda r: (r, 0)) for _ in range(last_n)
        ]
    else:
        # (L, B, S, H) -> (L, rows, H); layer selection happens inside the
        # index_map, so only the last_n layers' bytes are ever read from HBM.
        flat = stacked.reshape(L, rows, H)
        inputs = [flat] * last_n
        in_specs = [
            pl.BlockSpec((pl.Squeezed(), TS, H),
                         lambda r, i=i: (L - 1 - i, r, 0))
            for i in range(last_n)
        ]

    out_spec = pl.BlockSpec((TS, last_n * H), lambda r: (r, 0))

    grid_spec = pltpu.PrefetchScalarGridSpec(
        num_scalar_prefetch=0,
        grid=(n_r,),
        in_specs=in_specs,
        out_specs=out_spec,
    )

    bytes_accessed = 2 * last_n * rows * H * itemsize  # read + write
    cost = pl.CostEstimate(
        flops=0, transcendentals=0, bytes_accessed=bytes_accessed
    )

    # TODO(synk): if this copy is never fused with downstream compute, a plain
    # jnp.concatenate on the sliced layers reaches the same HBM roofline.
    out_flat = pl.pallas_call(
        kernel,
        out_shape=jax.ShapeDtypeStruct((rows, last_n * H), dtype),
        grid_spec=grid_spec,
        compiler_params=pltpu.CompilerParams(
            dimension_semantics=("parallel",),
            vmem_limit_bytes=vmem_limit,
        ),
        cost_estimate=cost,
    )(*inputs)
    return out_flat.reshape(B, S, last_n * H)


if __name__ == "__main__":
    key = jax.random.PRNGKey(0)

    # Small, TPU-friendly shapes: hidden=128 keeps the lane dim aligned.
    L, B, S, H = 6, 2, 8, 128
    last_n = 4

    keys = jax.random.split(key, L)
    hidden_states = tuple(
        jax.random.normal(k, (B, S, H), dtype=jnp.float32) for k in keys
    )

    # Pure-JAX reference.
    ref = jnp.concatenate(
        [hidden_states[-(i + 1)] for i in range(last_n)], axis=-1
    )

    # Tuple-of-layers path.
    out = concatenate_pooling(hidden_states, last_n)
    out = jax.block_until_ready(out)
    assert out.shape == (B, S, H * last_n), out.shape
    assert jnp.array_equal(out, ref), "mismatch vs reference (tuple path)"

    # Stacked (L, B, S, H) path (layer indexing done inside the BlockSpecs).
    stacked = jnp.stack(hidden_states)
    out2 = concatenate_pooling(stacked, last_n)
    out2 = jax.block_until_ready(out2)
    assert jnp.array_equal(out2, ref), "mismatch vs reference (stacked path)"

    print("KERNEL_OK")
</pallas_src>

<mosaic_0001>
module attributes {stable_mosaic.version = 11 : i64} {
  func.func @kernel(%arg0: i32, %arg1: memref<16x128xf32, #tpu.memory_space<vmem>>, %arg2: memref<16x128xf32, #tpu.memory_space<vmem>>, %arg3: memref<16x128xf32, #tpu.memory_space<vmem>>, %arg4: memref<16x128xf32, #tpu.memory_space<vmem>>, %arg5: memref<16x512xf32, #tpu.memory_space<vmem>>) attributes {dimension_semantics = [#tpu.dimension_semantics<parallel>], iteration_bounds = array<i64: 1>, scalar_prefetch = 0 : i64, scratch_operands = 0 : i64, tpu.core_type = #tpu.core_type<tc>, window_params = [{transform_indices = @transform_0, window_bounds = array<i64: 16, 128>}, {transform_indices = @transform_1, window_bounds = array<i64: 16, 128>}, {transform_indices = @transform_2, window_bounds = array<i64: 16, 128>}, {transform_indices = @transform_3, window_bounds = array<i64: 16, 128>}, {transform_indices = @transform_4, window_bounds = array<i64: 16, 512>}]} {
    %c0 = arith.constant 0 : index
    %c0_0 = arith.constant 0 : index
    %0 = vector.load %arg1[%c0, %c0_0] : memref<16x128xf32, #tpu.memory_space<vmem>>, vector<16x128xf32>
    %c0_1 = arith.constant 0 : index
    %c0_2 = arith.constant 0 : index
    %1 = vector.load %arg5[%c0_1, %c0_2] : memref<16x512xf32, #tpu.memory_space<vmem>>, vector<16x128xf32>
    tpu.vector_store %arg5[%c0_1, %c0_2], %0 {strides = array<i32>} : memref<16x512xf32, #tpu.memory_space<vmem>>, vector<16x128xf32>,
    %c0_3 = arith.constant 0 : index
    %c0_4 = arith.constant 0 : index
    %2 = vector.load %arg2[%c0_3, %c0_4] : memref<16x128xf32, #tpu.memory_space<vmem>>, vector<16x128xf32>
    %c0_5 = arith.constant 0 : index
    %c128 = arith.constant 128 : index
    %3 = vector.load %arg5[%c0_5, %c128] : memref<16x512xf32, #tpu.memory_space<vmem>>, vector<16x128xf32>
    tpu.vector_store %arg5[%c0_5, %c128], %2 {strides = array<i32>} : memref<16x512xf32, #tpu.memory_space<vmem>>, vector<16x128xf32>,
    %c0_6 = arith.constant 0 : index
    %c0_7 = arith.constant 0 : index
    %4 = vector.load %arg3[%c0_6, %c0_7] : memref<16x128xf32, #tpu.memory_space<vmem>>, vector<16x128xf32>
    %c0_8 = arith.constant 0 : index
    %c256 = arith.constant 256 : index
    %5 = vector.load %arg5[%c0_8, %c256] : memref<16x512xf32, #tpu.memory_space<vmem>>, vector<16x128xf32>
    tpu.vector_store %arg5[%c0_8, %c256], %4 {strides = array<i32>} : memref<16x512xf32, #tpu.memory_space<vmem>>, vector<16x128xf32>,
    %c0_9 = arith.constant 0 : index
    %c0_10 = arith.constant 0 : index
    %6 = vector.load %arg4[%c0_9, %c0_10] : memref<16x128xf32, #tpu.memory_space<vmem>>, vector<16x128xf32>
    %c0_11 = arith.constant 0 : index
    %c384 = arith.constant 384 : index
    %7 = vector.load %arg5[%c0_11, %c384] : memref<16x512xf32, #tpu.memory_space<vmem>>, vector<16x128xf32>
    tpu.vector_store %arg5[%c0_11, %c384], %6 {strides = array<i32>} : memref<16x512xf32, #tpu.memory_space<vmem>>, vector<16x128xf32>,
    return
  }
  func.func @transform_0(%arg0: i32) -> (i32, i32) {
    %c0_i32 = arith.constant 0 : i32
    %c0_i32_0 = arith.constant 0 : i32
    return %arg0, %c0_i32 : i32, i32
  }
  func.func @transform_1(%arg0: i32) -> (i32, i32) {
    %c0_i32 = arith.constant 0 : i32
    %c0_i32_0 = arith.constant 0 : i32
    return %arg0, %c0_i32 : i32, i32
  }
  func.func @transform_2(%arg0: i32) -> (i32, i32) {
    %c0_i32 = arith.constant 0 : i32
    %c0_i32_0 = arith.constant 0 : i32
    return %arg0, %c0_i32 : i32, i32
  }
  func.func @transform_3(%arg0: i32) -> (i32, i32) {
    %c0_i32 = arith.constant 0 : i32
    %c0_i32_0 = arith.constant 0 : i32
    return %arg0, %c0_i32 : i32, i32
  }
  func.func @transform_4(%arg0: i32) -> (i32, i32) {
    %c0_i32 = arith.constant 0 : i32
    %c0_i32_0 = arith.constant 0 : i32
    return %arg0, %c0_i32 : i32, i32
  }
}

</mosaic_0001>

<bundles_post_ra>
// kernel: tpu_custom_call.1
= control target key start
LH: loop header
LB: loop body
LE: loop exit
PB: predicated region body
PF: predicated region fallthrough
CT: control target
= control target key end

     0   :  { %9 = vsyncpa [#allocation3], 0  ;;  %s355_s0 = inlined_call_operand.hbm [shape: f32[16,128], index: 0, kind: input, shape index: {}]   ;;  %s356_s1 = inlined_call_operand.hbm [shape: f32[16,128], index: 1, kind: input, shape index: {}]   ;;  %s357_s2 = inlined_call_operand.hbm [shape: f32[16,128], index: 2, kind: input, shape index: {}]   ;;  %s358_s3 = inlined_call_operand.hbm [shape: f32[16,128], index: 3, kind: input, shape index: {}]   ;;  %s359_s4 = inlined_call_operand.hbm [shape: f32[16,512], index: 4, kind: output, shape index: {}]  }
   0x1   :  { %10 = vsyncpa [#allocation6], 0 }
   0x2   :  { %11 = vsyncpa [#allocation9], 0 }
   0x3   :  { %12 = vsyncpa [#allocation4], 0  ;;  %s235_s15 = smov [#allocation5]   ;;  %s236_s17 = smov [#allocation2]  }
   0x4   :  { %s30_s16 = sshll.u32 %s235_s15, 4  ;;  %s18_s18 = sshll.u32 %s236_s17, 4  ;;  %s31_s16 = int_to_ptr.vmem [resolvable:$true] %s30_s16  ;;  %s269_s18 = int_to_ptr.vmem [resolvable:$true] %s18_s18 }
   0x5   :  { %s117_s21 = scalar_lea.hbm %s356_s1, 256 }
   0x6   :  { %p118_p0 = scmp.ne.s32.totalorder %s356_s1, %s117_s21  ;;  %p121_p1 = scmp.lt.u32.totalorder %s117_s21, %s356_s1 }
   0x8   :  { %p123_p2 = pnand %p121_p1, %p118_p0 }
   0xa   :  { %126 = shalt.err (!%p123_p2)
}
   0xb   :  { %s127_s26 = scalar_lea.vmem %s31_s16, 256  ;;  %p132_p4 = scmp.lt.s32.totalorder %s31_s16, %s31_s16 }
   0xc   :  { %p128_p3 = scmp.ne.s32.totalorder %s31_s16, %s127_s26  ;;  %p133_p5 = scmp.lt.s32.totalorder %s127_s26, %s127_s26 }
   0xe   :  { %p134_p6 = por %p133_p5, %p132_p4 }
  0x10   :  { %p135_p7 = pnand %p134_p6, %p128_p3 }
  0x12   :  { %138 = shalt.err (!%p135_p7)
}
  0x13   :  { %s237_s27 = smov 128   ;;  %s238_s28 = smov 8  }
  0x14   :  { %36 = dma.hbm_to_vmem [thread:$0]  %s356_s1, 256, %s31_s16, [#allocation6], %s237_s27, %s237_s27, %s238_s28  }
  0x15   :  { %s139_s7 = scalar_lea.hbm %s355_s0, 256 }
  0x16   :  { %p140_p8 = scmp.ne.s32.totalorder %s355_s0, %s139_s7  ;;  %p143_p9 = scmp.lt.u32.totalorder %s139_s7, %s355_s0 }
  0x18   :  { %p145_p10 = pnand %p143_p9, %p140_p8 }
  0x1a   :  { %148 = shalt.err (!%p145_p10)
}
  0x1b   :  { %s149_s12 = scalar_lea.vmem %s269_s18, 256  ;;  %p154_p12 = scmp.lt.s32.totalorder %s269_s18, %s269_s18 }
  0x1c   :  { %p150_p11 = scmp.ne.s32.totalorder %s269_s18, %s149_s12  ;;  %p155_p13 = scmp.lt.s32.totalorder %s149_s12, %s149_s12 }
  0x1e   :  { %p156_p0 = por %p155_p13, %p154_p12 }
  0x20   :  { %p157_p1 = pnand %p156_p0, %p150_p11 }
  0x22   :  { %160 = shalt.err (!%p157_p1)
}
  0x23   :  { %24 = dma.hbm_to_vmem [thread:$0]  %s355_s0, 256, %s269_s18, [#allocation3], %s237_s27, %s237_s27, %s238_s28  }
  0x24   :  { %s239_s14 = smov [#allocation7]   ;;  %s240_s16 = smov [#allocation8]  }
  0x25   :  { %s42_s15 = sshll.u32 %s239_s14, 4  ;;  %s54_s17 = sshll.u32 %s240_s16, 4  ;;  %s43_s15 = int_to_ptr.vmem [resolvable:$true] %s42_s15  ;;  %s306_s17 = int_to_ptr.vmem [resolvable:$true] %s54_s17 }
  0x26   :  { %s161_s21 = scalar_lea.hbm %s357_s2, 256 }
  0x27   :  { %p162_p2 = scmp.ne.s32.totalorder %s357_s2, %s161_s21  ;;  %p165_p3 = scmp.lt.u32.totalorder %s161_s21, %s357_s2 }
  0x29   :  { %p167_p4 = pnand %p165_p3, %p162_p2 }
  0x2b   :  { %170 = shalt.err (!%p167_p4)
}
  0x2c   :  { %s171_s0 = scalar_lea.vmem %s43_s15, 256  ;;  %p176_p6 = scmp.lt.s32.totalorder %s43_s15, %s43_s15 }
  0x2d   :  { %p172_p5 = scmp.ne.s32.totalorder %s43_s15, %s171_s0  ;;  %p177_p7 = scmp.lt.s32.totalorder %s171_s0, %s171_s0 }
  0x2f   :  { %p178_p8 = por %p177_p7, %p176_p6 }
  0x31   :  { %p179_p9 = pnand %p178_p8, %p172_p5 }
  0x33   :  { %182 = shalt.err (!%p179_p9)
}
  0x34   :  { %48 = dma.hbm_to_vmem [thread:$0]  %s357_s2, 256, %s43_s15, [#allocation6], %s237_s27, %s237_s27, %s238_s28  }
  0x35   :  { %s183_s5 = scalar_lea.hbm %s358_s3, 256 }
  0x36   :  { %p184_p10 = scmp.ne.s32.totalorder %s358_s3, %s183_s5  ;;  %p187_p11 = scmp.lt.u32.totalorder %s183_s5, %s358_s3 }
  0x38   :  { %p189_p12 = pnand %p187_p11, %p184_p10 }
  0x3a   :  { %192 = shalt.err (!%p189_p12)
}
  0x3b   :  { %s193_s10 = scalar_lea.vmem %s306_s17, 256  ;;  %p198_p0 = scmp.lt.s32.totalorder %s306_s17, %s306_s17 }
  0x3c   :  { %p194_p13 = scmp.ne.s32.totalorder %s306_s17, %s193_s10  ;;  %p199_p1 = scmp.lt.s32.totalorder %s193_s10, %s193_s10 }
  0x3e   :  { %p200_p2 = por %p199_p1, %p198_p0 }
  0x40   :  { %p201_p3 = pnand %p200_p2, %p194_p13 }
  0x42   :  { %204 = shalt.err (!%p201_p3)
}
  0x43   :  { %60 = dma.hbm_to_vmem [thread:$0]  %s358_s3, 256, %s306_s17, [#allocation9], %s237_s27, %s237_s27, %s238_s28  }
  0x44   :  { %227 = dma.done.wait [#allocation3], 256  }
  0x45   :  { %228 = vsyncadd [#allocation3], 4294967040 }
  0x46   :  { %229 = dma.done.wait [#allocation6], 512  }
  0x47   :  { %230 = vsyncadd [#allocation6], 4294966784 }
  0x48   :  { %231 = dma.done.wait [#allocation9], 256  }
  0x49   :  { %232 = vsyncadd [#allocation9], 4294967040  ;;  %s241_s12 = smov [#allocation10]   ;;  %v73_v0 = vld [vmem:[#allocation2] sm:$0xff]  ;;  %v74_v1 = vld [vmem:[#allocation2 + $0x8] sm:$0xff] }
  0x4a   :  { %s94_s1 = sshll.u32 %s241_s12, 4  ;;  %v77_v2 = vld [vmem:[#allocation5] sm:$0xff]  ;;  %75 = vst [vmem:[#allocation10] sm:$0xff] %v73_v0  ;;  %76 = vst [vmem:[#allocation10 + $0x20] sm:$0xff] %v74_v1  ;;  %v78_v3 = vld [vmem:[#allocation5 + $0x8] sm:$0xff]  ;;  %s95_s1 = int_to_ptr.vmem [resolvable:$true] %s94_s1 }
  0x4b   :  { %79 = vst [vmem:[#allocation10 + $0x8] sm:$0xff] %v77_v2  ;;  %v81_v4 = vld [vmem:[#allocation7] sm:$0xff]  ;;  %v82_v5 = vld [vmem:[#allocation7 + $0x8] sm:$0xff]  ;;  %80 = vst [vmem:[#allocation10 + $0x28] sm:$0xff] %v78_v3  ;;  %s205_s3 = scalar_lea.vmem %s95_s1, 1024  ;;  %p210_p5 = scmp.lt.s32.totalorder %s95_s1, %s95_s1 }
  0x4c   :  { %83 = vst [vmem:[#allocation10 + $0x10] sm:$0xff] %v81_v4  ;;  %84 = vst [vmem:[#allocation10 + $0x30] sm:$0xff] %v82_v5  ;;  %v85_v6 = vld [vmem:[#allocation8] sm:$0xff]  ;;  %v86_v7 = vld [vmem:[#allocation8 + $0x8] sm:$0xff]  ;;  %p206_p4 = scmp.ne.s32.totalorder %s95_s1, %s205_s3  ;;  %p211_p6 = scmp.lt.s32.totalorder %s205_s3, %s205_s3 }
  0x4d   :  { %87 = vst [vmem:[#allocation10 + $0x18] sm:$0xff] %v85_v6  ;;  %88 = vst [vmem:[#allocation10 + $0x38] sm:$0xff] %v86_v7 }
  0x4e   :  { %p212_p7 = por %p211_p6, %p210_p5 }
  0x50   :  { %p213_p8 = pnand %p212_p7, %p206_p4 }
  0x52   :  { %216 = shalt.err (!%p213_p8)
}
  0x53   :  { %s217_s13 = scalar_lea.hbm %s359_s4, 1024 }
  0x54   :  { %p218_p9 = scmp.ne.s32.totalorder %s359_s4, %s217_s13  ;;  %p221_p10 = scmp.lt.u32.totalorder %s217_s13, %s359_s4 }
  0x56   :  { %p223_p11 = pnand %p221_p10, %p218_p9 }
  0x58   :  { %226 = shalt.err (!%p223_p11)
}
  0x59   :  { %s242_s19 = smov 512   ;;  %s243_s20 = smov 32  }
  0x5a   :  { %100 = dma.vmem_to_hbm [thread:$0]  %s95_s1, 1024, %s359_s4, [#allocation4], %s242_s19, %s242_s19, %s243_s20  }
  0x5b   :  { %233 = dma.done.wait [#allocation4], 1024  }
  0x5c   :  { %234 = vsyncadd [#allocation4], 4294966272 }
  0x5d   :  { %104 = vsyncpa [#allocation3], 1 }
  0x5e   :  { %105 = vsyncpa [#allocation6], 1 }
  0x5f   :  { %106 = vsyncpa [#allocation9], 1 }
  0x60   :  { %107 = vsyncpa [#allocation4], 1 }

</bundles_post_ra>
